<compile_context>
chip_gen: v7x
topology: tpu7x:2x2x1
jax: 0.10.0
libtpu: 0.0.40
codegen_flags: <defaults>
</compile_context>

<pallas_src>
from functools import partial

import jax
import jax.numpy as jnp
from jax.experimental import pallas as pl
from jax.experimental.pallas import tpu as pltpu

NEG_SLOPE = -0.2  # matches nn.LeakyReLU(-0.2)


def fused_unet_block_kernel(x_ref, w1_ref, b1_ref, w2_ref, b2_ref, o_ref,
                            xpad_ref, midpad_ref, *, NB, H):
    """NB batch images per step: conv1 + LReLU + conv2 + LReLU, all in VMEM.

    x_ref:      (NB, H, W*Cin)          lane-dense NHWC-flattened input (f32)
    w1_ref:     (3, W*Cin, W*C1)        banded conv1 weights, bf16
    b1_ref:     (1, W*C1)               conv1 bias tiled over w, f32
    w2_ref:     (3, W*C1, W*C2)         banded conv2 weights, bf16
    b2_ref:     (1, W*C2)               conv2 bias tiled over w, f32
    o_ref:      (NB, H, W*C2)           lane-dense output
    xpad_ref:   VMEM (NB*(H+2), W*Cin)  bf16, per-image vertical halo rows = 0
    midpad_ref: VMEM (NB*(H+2), W*C1)   bf16, per-image vertical halo rows = 0
    """
    Hp = H + 2
    Mf = NB * Hp - 2                 # matmul M; 2 junk rows per image boundary
    Kin = xpad_ref.shape[1]
    K1 = midpad_ref.shape[1]
    K2 = o_ref.shape[2]

    zin = jnp.zeros((1, Kin), jnp.bfloat16)
    zmid = jnp.zeros((1, K1), jnp.bfloat16)

    # Stack NB images into the padded slab.  Only the 2 halo rows per image
    # need zeroing (interior rows are fully overwritten every step); done every
    # step -- cheap -- rather than gated on program_id (unsafe under megacore).
    for b in range(NB):
        r0 = b * Hp
        xpad_ref[r0:r0 + 1, :] = zin
        xpad_ref[r0 + H + 1:r0 + H + 2, :] = zin
        xpad_ref[r0 + 1:r0 + H + 1, :] = x_ref[b].astype(jnp.bfloat16)

    # ---- conv1 (3x3, stride 1, pad 1) + LeakyReLU(-0.2) ----
    # 3 bf16 MXU matmuls, M = Mf, K = W*Cin, N = W*C1, f32 accumulation.
    acc1 = jnp.zeros((Mf, K1), jnp.float32)
    for dy in range(3):
        acc1 += jnp.dot(xpad_ref[dy:dy + Mf, :], w1_ref[dy],
                        preferred_element_type=jnp.float32)
    acc1 = acc1 + b1_ref[...]
    acc1 = jnp.where(acc1 > 0, acc1, NEG_SLOPE * acc1)      # f32 VPU math

    # Intermediate stays in VMEM (bf16, never written to HBM); zero halo rows
    # implement conv2's vertical padding.  Junk boundary rows are dropped here.
    for b in range(NB):
        r0 = b * Hp
        midpad_ref[r0:r0 + 1, :] = zmid
        midpad_ref[r0 + H + 1:r0 + H + 2, :] = zmid
        midpad_ref[r0 + 1:r0 + H + 1, :] = acc1[r0:r0 + H].astype(jnp.bfloat16)

    # ---- conv2 (3x3, stride 1, pad 1) + LeakyReLU(-0.2) ----
    acc2 = jnp.zeros((Mf, K2), jnp.float32)
    for dy in range(3):
        acc2 += jnp.dot(midpad_ref[dy:dy + Mf, :], w2_ref[dy],
                        preferred_element_type=jnp.float32)
    acc2 = acc2 + b2_ref[...]
    acc2 = jnp.where(acc2 > 0, acc2, NEG_SLOPE * acc2)

    for b in range(NB):
        r0 = b * Hp
        o_ref[b] = acc2[r0:r0 + H].astype(o_ref.dtype)


def _band_weights(w_hwio, W):
    """HWIO (3,3,Cin,Cout) -> banded matrices (3, W*Cin, W*Cout).

    B[dy, w'*Cin+ci, w*Cout+co] = w_hwio[dy, w'-w+1, ci, co]  if |w'-w| <= 1
                                  0                            otherwise
    so that out[h, w*Cout+co] = sum_dy (Xv[h+dy, :] @ B[dy])[w*Cout+co],
    where Xv is the vertically-padded, lane-dense activation.  The zero
    entries off the band implement the horizontal zero padding.
    """
    kh, kw, cin, cout = w_hwio.shape
    wp = jnp.arange(W)                              # w' (input col block)
    wo = jnp.arange(W)                              # w  (output col block)
    dx = wp[:, None] - wo[None, :] + 1              # (W, W), tap index
    valid = (dx >= 0) & (dx <= 2)
    taps = w_hwio[:, jnp.clip(dx, 0, 2)]            # (3, W, W, Cin, Cout)
    taps = jnp.where(valid[None, :, :, None, None], taps, 0.0)
    # (dy, w', ci, w, co) -> (dy, W*Cin, W*Cout)
    return jnp.transpose(taps, (0, 1, 3, 2, 4)).reshape(kh, W * cin, W * cout)


def _pick_nb(N, H, m_target=256):
    """Images per grid step: fill MXU M (<= m_target rows, vreg budget) while
    keeping the grid length >= 2 when N >= 2 (v7x has 2 TensorCores)."""
    best = 1
    for nb in range(1, N + 1):
        if N % nb != 0:
            continue
        if nb * H > m_target:
            continue
        if N >= 2 and (N // nb) < 2:
            continue
        best = nb
    return best


def very_simple_unet_block(x_nchw, params, *, nb=None):
    """Forward pass matching the PyTorch module; input/output are NCHW."""
    N, Cin, H, W = x_nchw.shape
    C1 = params["w1"].shape[-1]
    C2 = params["w2"].shape[-1]
    if nb is None:
        nb = _pick_nb(N, H)
    assert N % nb == 0

    # Single layout change at the module boundary; the (N,H,W,C)->(N,H,W*C)
    # flatten is a free row-major reshape.
    x = jnp.transpose(x_nchw, (0, 2, 3, 1)).reshape(N, H, W * Cin)

    # bf16 banded weights (MXU-native, halves weight HBM/VMEM traffic).
    B1 = _band_weights(params["w1"], W).astype(jnp.bfloat16)   # (3, W*Cin, W*C1)
    B2 = _band_weights(params["w2"], W).astype(jnp.bfloat16)   # (3, W*C1,  W*C2)
    bias1 = jnp.tile(params["b1"], W).reshape(1, W * C1).astype(jnp.float32)
    bias2 = jnp.tile(params["b2"], W).reshape(1, W * C2).astype(jnp.float32)

    # NOTE: for large W, strip-tile W and set pipeline_mode=pl.Buffered(1) on
    # the constant weight specs (index_map never changes) to respect v7x VMEM.
    out = pl.pallas_call(
        partial(fused_unet_block_kernel, NB=nb, H=H),
        out_shape=jax.ShapeDtypeStruct((N, H, W * C2), x_nchw.dtype),
        grid=(N // nb,),
        in_specs=[
            pl.BlockSpec((nb, H, W * Cin), lambda n: (n, 0, 0)),
            pl.BlockSpec((3, W * Cin, W * C1), lambda n: (0, 0, 0)),
            pl.BlockSpec((1, W * C1), lambda n: (0, 0)),
            pl.BlockSpec((3, W * C1, W * C2), lambda n: (0, 0, 0)),
            pl.BlockSpec((1, W * C2), lambda n: (0, 0)),
        ],
        out_specs=pl.BlockSpec((nb, H, W * C2), lambda n: (n, 0, 0)),
        scratch_shapes=[
            pltpu.VMEM((nb * (H + 2), W * Cin), jnp.bfloat16),   # padded input
            pltpu.VMEM((nb * (H + 2), W * C1), jnp.bfloat16),    # padded mid
        ],
        compiler_params=pltpu.CompilerParams(
            dimension_semantics=("parallel",)),
    )(x, B1, bias1, B2, bias2)

    return jnp.transpose(out.reshape(N, H, W, C2), (0, 3, 1, 2))


# ---------------- pure-JAX reference (for self-check) ----------------
def _ref_conv(x_nchw, w_hwio, bias):
    w_oihw = jnp.transpose(w_hwio, (3, 2, 0, 1))
    y = jax.lax.conv_general_dilated(
        x_nchw, w_oihw, window_strides=(1, 1), padding=((1, 1), (1, 1)),
        dimension_numbers=("NCHW", "OIHW", "NCHW"))
    return y + bias[None, :, None, None]


def _ref_forward(x, p):
    lrelu = lambda v: jnp.where(v > 0, v, NEG_SLOPE * v)
    y = lrelu(_ref_conv(x, p["w1"], p["b1"]))
    y = lrelu(_ref_conv(y, p["w2"], p["b2"]))
    return y


if __name__ == "__main__":
    in_channels, out_channels = 4, 8
    N, H, W = 2, 16, 16

    key = jax.random.PRNGKey(0)
    kx, k1, k2, k3, k4 = jax.random.split(key, 5)

    x = jax.random.normal(kx, (N, in_channels, H, W), jnp.float32)
    params = {
        "w1": 0.1 * jax.random.normal(k1, (3, 3, in_channels, out_channels), jnp.float32),
        "b1": 0.1 * jax.random.normal(k2, (out_channels,), jnp.float32),
        "w2": 0.1 * jax.random.normal(k3, (3, 3, out_channels, out_channels), jnp.float32),
        "b2": 0.1 * jax.random.normal(k4, (out_channels,), jnp.float32),
    }

    # bf16 weights/intermediate -> loosened tolerance vs f32 reference.
    TOL = dict(atol=5e-2, rtol=5e-2)

    # N=2: NB=1 (grid stays 2 for v7x's two TensorCores).
    out = jax.block_until_ready(very_simple_unet_block(x, params))
    ref = jax.block_until_ready(_ref_forward(x, params))
    assert out.shape == (N, out_channels, H, W)
    assert jnp.allclose(out, ref, **TOL), float(jnp.max(jnp.abs(out - ref)))

    # Larger batch exercises the NB>1 (images-stacked-per-grid-step) path.
    x8 = jax.random.normal(kx, (8, in_channels, H, W), jnp.float32)
    out8 = jax.block_until_ready(very_simple_unet_block(x8, params))
    ref8 = jax.block_until_ready(_ref_forward(x8, params))
    assert jnp.allclose(out8, ref8, **TOL), float(jnp.max(jnp.abs(out8 - ref8)))

    print("KERNEL_OK")
</pallas_src>

<mosaic_0001>
module attributes {stable_mosaic.version = 11 : i64} {
  func.func @fused_unet_block_kernel(%arg0: i32, %arg1: memref<1x16x64xf32, #tpu.memory_space<vmem>>, %arg2: memref<3x64x128xbf16, #tpu.memory_space<vmem>>, %arg3: memref<1x128xf32, #tpu.memory_space<vmem>>, %arg4: memref<3x128x128xbf16, #tpu.memory_space<vmem>>, %arg5: memref<1x128xf32, #tpu.memory_space<vmem>>, %arg6: memref<1x16x128xf32, #tpu.memory_space<vmem>>, %arg7: memref<18x64xbf16, #tpu.memory_space<vmem>>, %arg8: memref<18x128xbf16, #tpu.memory_space<vmem>>) attributes {dimension_semantics = [#tpu.dimension_semantics<parallel>], iteration_bounds = array<i64: 2>, scalar_prefetch = 0 : i64, scratch_operands = 2 : i64, tpu.core_type = #tpu.core_type<tc>, window_params = [{transform_indices = @transform_0, window_bounds = array<i64: 1, 16, 64>}, {pipeline_mode = #tpu.pipeline_mode<synchronous>, transform_indices = @transform_1, window_bounds = array<i64: 3, 64, 128>}, {pipeline_mode = #tpu.pipeline_mode<synchronous>, transform_indices = @transform_2, window_bounds = array<i64: 1, 128>}, {pipeline_mode = #tpu.pipeline_mode<synchronous>, transform_indices = @transform_3, window_bounds = array<i64: 3, 128, 128>}, {pipeline_mode = #tpu.pipeline_mode<synchronous>, transform_indices = @transform_4, window_bounds = array<i64: 1, 128>}, {transform_indices = @transform_5, window_bounds = array<i64: 1, 16, 128>}]} {
    %cst = arith.constant 0.000000e+00 : bf16
    %0 = vector.broadcast %cst : bf16 to vector<1x64xbf16>
    %cst_0 = arith.constant 0.000000e+00 : bf16
    %1 = vector.broadcast %cst_0 : bf16 to vector<1x128xbf16>
    %c0 = arith.constant 0 : index
    %c0_1 = arith.constant 0 : index
    %2 = vector.load %arg7[%c0, %c0_1] : memref<18x64xbf16, #tpu.memory_space<vmem>>, vector<1x64xbf16>
    tpu.vector_store %arg7[%c0, %c0_1], %0 {strides = array<i32>} : memref<18x64xbf16, #tpu.memory_space<vmem>>, vector<1x64xbf16>,
    %c17 = arith.constant 17 : index
    %c0_2 = arith.constant 0 : index
    %3 = vector.load %arg7[%c17, %c0_2] : memref<18x64xbf16, #tpu.memory_space<vmem>>, vector<1x64xbf16>
    tpu.vector_store %arg7[%c17, %c0_2], %0 {strides = array<i32>} : memref<18x64xbf16, #tpu.memory_space<vmem>>, vector<1x64xbf16>,
    %c0_3 = arith.constant 0 : index
    %c0_4 = arith.constant 0 : index
    %c0_5 = arith.constant 0 : index
    %4 = vector.load %arg1[%c0_3, %c0_4, %c0_5] : memref<1x16x64xf32, #tpu.memory_space<vmem>>, vector<1x16x64xf32>
    %5 = vector.shape_cast %4 : vector<1x16x64xf32> to vector<16x64xf32>
    %6 = arith.truncf %5 : vector<16x64xf32> to vector<16x64xbf16>
    %c1 = arith.constant 1 : index
    %c0_6 = arith.constant 0 : index
    %7 = vector.load %arg7[%c1, %c0_6] : memref<18x64xbf16, #tpu.memory_space<vmem>>, vector<16x64xbf16>
    tpu.vector_store %arg7[%c1, %c0_6], %6 {strides = array<i32>} : memref<18x64xbf16, #tpu.memory_space<vmem>>, vector<16x64xbf16>,
    %cst_7 = arith.constant 0.000000e+00 : f32
    %8 = vector.broadcast %cst_7 : f32 to vector<16x128xf32>
    %c0_8 = arith.constant 0 : index
    %c0_9 = arith.constant 0 : index
    %9 = vector.load %arg7[%c0_8, %c0_9] : memref<18x64xbf16, #tpu.memory_space<vmem>>, vector<16x64xbf16>
    %c0_10 = arith.constant 0 : index
    %c0_11 = arith.constant 0 : index
    %c0_12 = arith.constant 0 : index
    %10 = vector.load %arg2[%c0_10, %c0_11, %c0_12] : memref<3x64x128xbf16, #tpu.memory_space<vmem>>, vector<1x64x128xbf16>
    %11 = vector.shape_cast %10 : vector<1x64x128xbf16> to vector<64x128xbf16>
    %cst_13 = arith.constant dense<0.000000e+00> : vector<16x128xf32>
    %12 = tpu.matmul %9, %11, %cst_13 {dimension_numbers = #tpu.dot_dimension_numbers<[1], [0], [0], [1], [0, 0, 1, 1], [], []>} : vector<16x64xbf16>, vector<64x128xbf16>, vector<16x128xf32> -> vector<16x128xf32>
    %13 = arith.addf %8, %12 : vector<16x128xf32>
    %c1_14 = arith.constant 1 : index
    %c0_15 = arith.constant 0 : index
    %14 = vector.load %arg7[%c1_14, %c0_15] : memref<18x64xbf16, #tpu.memory_space<vmem>>, vector<16x64xbf16>
    %c1_16 = arith.constant 1 : index
    %c0_17 = arith.constant 0 : index
    %c0_18 = arith.constant 0 : index
    %15 = vector.load %arg2[%c1_16, %c0_17, %c0_18] : memref<3x64x128xbf16, #tpu.memory_space<vmem>>, vector<1x64x128xbf16>
    %16 = vector.shape_cast %15 : vector<1x64x128xbf16> to vector<64x128xbf16>
    %cst_19 = arith.constant dense<0.000000e+00> : vector<16x128xf32>
    %17 = tpu.matmul %14, %16, %cst_19 {dimension_numbers = #tpu.dot_dimension_numbers<[1], [0], [0], [1], [0, 0, 1, 1], [], []>} : vector<16x64xbf16>, vector<64x128xbf16>, vector<16x128xf32> -> vector<16x128xf32>
    %18 = arith.addf %13, %17 : vector<16x128xf32>
    %c2 = arith.constant 2 : index
    %c0_20 = arith.constant 0 : index
    %19 = vector.load %arg7[%c2, %c0_20] : memref<18x64xbf16, #tpu.memory_space<vmem>>, vector<16x64xbf16>
    %c2_21 = arith.constant 2 : index
    %c0_22 = arith.constant 0 : index
    %c0_23 = arith.constant 0 : index
    %20 = vector.load %arg2[%c2_21, %c0_22, %c0_23] : memref<3x64x128xbf16, #tpu.memory_space<vmem>>, vector<1x64x128xbf16>
    %21 = vector.shape_cast %20 : vector<1x64x128xbf16> to vector<64x128xbf16>
    %cst_24 = arith.constant dense<0.000000e+00> : vector<16x128xf32>
    %22 = tpu.matmul %19, %21, %cst_24 {dimension_numbers = #tpu.dot_dimension_numbers<[1], [0], [0], [1], [0, 0, 1, 1], [], []>} : vector<16x64xbf16>, vector<64x128xbf16>, vector<16x128xf32> -> vector<16x128xf32>
    %23 = arith.addf %18, %22 : vector<16x128xf32>
    %c0_25 = arith.constant 0 : index
    %c0_26 = arith.constant 0 : index
    %24 = vector.load %arg3[%c0_25, %c0_26] : memref<1x128xf32, #tpu.memory_space<vmem>>, vector<1x128xf32>
    %25 = vector.broadcast %24 : vector<1x128xf32> to vector<16x128xf32>
    %26 = arith.addf %23, %25 : vector<16x128xf32>
    %cst_27 = arith.constant 0.000000e+00 : f32
    %27 = vector.broadcast %cst_27 : f32 to vector<16x128xf32>
    %28 = arith.cmpf ogt, %26, %27 : vector<16x128xf32>
    %cst_28 = arith.constant -2.000000e-01 : f32
    %29 = vector.broadcast %cst_28 : f32 to vector<16x128xf32>
    %30 = arith.mulf %29, %26 : vector<16x128xf32>
    %31 = arith.select %28, %26, %30 : vector<16x128xi1>, vector<16x128xf32>
    %c0_29 = arith.constant 0 : index
    %c0_30 = arith.constant 0 : index
    %32 = vector.load %arg8[%c0_29, %c0_30] : memref<18x128xbf16, #tpu.memory_space<vmem>>, vector<1x128xbf16>
    tpu.vector_store %arg8[%c0_29, %c0_30], %1 {strides = array<i32>} : memref<18x128xbf16, #tpu.memory_space<vmem>>, vector<1x128xbf16>,
    %c17_31 = arith.constant 17 : index
    %c0_32 = arith.constant 0 : index
    %33 = vector.load %arg8[%c17_31, %c0_32] : memref<18x128xbf16, #tpu.memory_space<vmem>>, vector<1x128xbf16>
    tpu.vector_store %arg8[%c17_31, %c0_32], %1 {strides = array<i32>} : memref<18x128xbf16, #tpu.memory_space<vmem>>, vector<1x128xbf16>,
    %34 = arith.truncf %31 : vector<16x128xf32> to vector<16x128xbf16>
    %c1_33 = arith.constant 1 : index
    %c0_34 = arith.constant 0 : index
    %35 = vector.load %arg8[%c1_33, %c0_34] : memref<18x128xbf16, #tpu.memory_space<vmem>>, vector<16x128xbf16>
    tpu.vector_store %arg8[%c1_33, %c0_34], %34 {strides = array<i32>} : memref<18x128xbf16, #tpu.memory_space<vmem>>, vector<16x128xbf16>,
    %cst_35 = arith.constant 0.000000e+00 : f32
    %36 = vector.broadcast %cst_35 : f32 to vector<16x128xf32>
    %c0_36 = arith.constant 0 : index
    %c0_37 = arith.constant 0 : index
    %37 = vector.load %arg8[%c0_36, %c0_37] : memref<18x128xbf16, #tpu.memory_space<vmem>>, vector<16x128xbf16>
    %c0_38 = arith.constant 0 : index
    %c0_39 = arith.constant 0 : index
    %c0_40 = arith.constant 0 : index
    %38 = vector.load %arg4[%c0_38, %c0_39, %c0_40] : memref<3x128x128xbf16, #tpu.memory_space<vmem>>, vector<1x128x128xbf16>
    %39 = vector.shape_cast %38 : vector<1x128x128xbf16> to vector<128x128xbf16>
    %cst_41 = arith.constant dense<0.000000e+00> : vector<16x128xf32>
    %40 = tpu.matmul %37, %39, %cst_41 {dimension_numbers = #tpu.dot_dimension_numbers<[1], [0], [0], [1], [0, 0, 1, 1], [], []>} : vector<16x128xbf16>, vector<128x128xbf16>, vector<16x128xf32> -> vector<16x128xf32>
    %41 = arith.addf %36, %40 : vector<16x128xf32>
    %c1_42 = arith.constant 1 : index
    %c0_43 = arith.constant 0 : index
    %42 = vector.load %arg8[%c1_42, %c0_43] : memref<18x128xbf16, #tpu.memory_space<vmem>>, vector<16x128xbf16>
    %c1_44 = arith.constant 1 : index
    %c0_45 = arith.constant 0 : index
    %c0_46 = arith.constant 0 : index
    %43 = vector.load %arg4[%c1_44, %c0_45, %c0_46] : memref<3x128x128xbf16, #tpu.memory_space<vmem>>, vector<1x128x128xbf16>
    %44 = vector.shape_cast %43 : vector<1x128x128xbf16> to vector<128x128xbf16>
    %cst_47 = arith.constant dense<0.000000e+00> : vector<16x128xf32>
    %45 = tpu.matmul %42, %44, %cst_47 {dimension_numbers = #tpu.dot_dimension_numbers<[1], [0], [0], [1], [0, 0, 1, 1], [], []>} : vector<16x128xbf16>, vector<128x128xbf16>, vector<16x128xf32> -> vector<16x128xf32>
    %46 = arith.addf %41, %45 : vector<16x128xf32>
    %c2_48 = arith.constant 2 : index
    %c0_49 = arith.constant 0 : index
    %47 = vector.load %arg8[%c2_48, %c0_49] : memref<18x128xbf16, #tpu.memory_space<vmem>>, vector<16x128xbf16>
    %c2_50 = arith.constant 2 : index
    %c0_51 = arith.constant 0 : index
    %c0_52 = arith.constant 0 : index
    %48 = vector.load %arg4[%c2_50, %c0_51, %c0_52] : memref<3x128x128xbf16, #tpu.memory_space<vmem>>, vector<1x128x128xbf16>
    %49 = vector.shape_cast %48 : vector<1x128x128xbf16> to vector<128x128xbf16>
    %cst_53 = arith.constant dense<0.000000e+00> : vector<16x128xf32>
    %50 = tpu.matmul %47, %49, %cst_53 {dimension_numbers = #tpu.dot_dimension_numbers<[1], [0], [0], [1], [0, 0, 1, 1], [], []>} : vector<16x128xbf16>, vector<128x128xbf16>, vector<16x128xf32> -> vector<16x128xf32>
    %51 = arith.addf %46, %50 : vector<16x128xf32>
    %c0_54 = arith.constant 0 : index
    %c0_55 = arith.constant 0 : index
    %52 = vector.load %arg5[%c0_54, %c0_55] : memref<1x128xf32, #tpu.memory_space<vmem>>, vector<1x128xf32>
    %53 = vector.broadcast %52 : vector<1x128xf32> to vector<16x128xf32>
    %54 = arith.addf %51, %53 : vector<16x128xf32>
    %cst_56 = arith.constant 0.000000e+00 : f32
    %55 = vector.broadcast %cst_56 : f32 to vector<16x128xf32>
    %56 = arith.cmpf ogt, %54, %55 : vector<16x128xf32>
    %cst_57 = arith.constant -2.000000e-01 : f32
    %57 = vector.broadcast %cst_57 : f32 to vector<16x128xf32>
    %58 = arith.mulf %57, %54 : vector<16x128xf32>
    %59 = arith.select %56, %54, %58 : vector<16x128xi1>, vector<16x128xf32>
    %c0_58 = arith.constant 0 : index
    %c0_59 = arith.constant 0 : index
    %c0_60 = arith.constant 0 : index
    %60 = vector.load %arg6[%c0_58, %c0_59, %c0_60] : memref<1x16x128xf32, #tpu.memory_space<vmem>>, vector<1x16x128xf32>
    %61 = vector.shape_cast %60 : vector<1x16x128xf32> to vector<16x128xf32>
    %62 = vector.shape_cast %59 : vector<16x128xf32> to vector<1x16x128xf32>
    tpu.vector_store %arg6[%c0_58, %c0_59, %c0_60], %62 {strides = array<i32>} : memref<1x16x128xf32, #tpu.memory_space<vmem>>, vector<1x16x128xf32>,
    return
  }
  func.func @transform_0(%arg0: i32) -> (i32, i32, i32) {
    %c0_i32 = arith.constant 0 : i32
    %c0_i32_0 = arith.constant 0 : i32
    %c0_i32_1 = arith.constant 0 : i32
    return %arg0, %c0_i32, %c0_i32_0 : i32, i32, i32
  }
  func.func @transform_1(%arg0: i32) -> (i32, i32, i32) {
    %c0_i32 = arith.constant 0 : i32
    %c0_i32_0 = arith.constant 0 : i32
    %c0_i32_1 = arith.constant 0 : i32
    %c0_i32_2 = arith.constant 0 : i32
    return %c0_i32, %c0_i32_0, %c0_i32_1 : i32, i32, i32
  }
  func.func @transform_2(%arg0: i32) -> (i32, i32) {
    %c0_i32 = arith.constant 0 : i32
    %c0_i32_0 = arith.constant 0 : i32
    %c0_i32_1 = arith.constant 0 : i32
    return %c0_i32, %c0_i32_0 : i32, i32
  }
  func.func @transform_3(%arg0: i32) -> (i32, i32, i32) {
    %c0_i32 = arith.constant 0 : i32
    %c0_i32_0 = arith.constant 0 : i32
    %c0_i32_1 = arith.constant 0 : i32
    %c0_i32_2 = arith.constant 0 : i32
    return %c0_i32, %c0_i32_0, %c0_i32_1 : i32, i32, i32
  }
  func.func @transform_4(%arg0: i32) -> (i32, i32) {
    %c0_i32 = arith.constant 0 : i32
    %c0_i32_0 = arith.constant 0 : i32
    %c0_i32_1 = arith.constant 0 : i32
    return %c0_i32, %c0_i32_0 : i32, i32
  }
  func.func @transform_5(%arg0: i32) -> (i32, i32, i32) {
    %c0_i32 = arith.constant 0 : i32
    %c0_i32_0 = arith.constant 0 : i32
    %c0_i32_1 = arith.constant 0 : i32
    return %arg0, %c0_i32, %c0_i32_0 : i32, i32, i32
  }
}

</mosaic_0001>

<bundles_post_ra>
// kernel: tpu_custom_call.1
= control target key start
LH: loop header
LB: loop body
LE: loop exit
PB: predicated region body
PF: predicated region fallthrough
CT: control target
= control target key end

     0   :  { %10 = vsyncpa [#allocation5], 0  ;;  %s1995_s0 = inlined_call_operand.hbm [shape: f32[2,16,64], index: 0, kind: input, shape index: {}]   ;;  %s1996_s1 = inlined_call_operand.hbm [shape: bf16[3,64,128], index: 1, kind: input, shape index: {}]   ;;  %s1997_s2 = inlined_call_operand.vmem [shape: f32[1,128], index: 2, kind: input, shape index: {}]   ;;  %s1998_s3 = inlined_call_operand.hbm [shape: bf16[3,128,128], index: 3, kind: input, shape index: {}]   ;;  %s1999_s4 = inlined_call_operand.vmem [shape: f32[1,128], index: 4, kind: input, shape index: {}]   ;;  %s2000_s5 = inlined_call_operand.hbm [shape: f32[2,16,128], index: 5, kind: output, shape index: {}]  }
   0x1   :  { %12 = vsyncpa [#allocation5 + $0x1], 0 }
   0x2   :  { %13 = vsyncpa [#allocation8], 0 }
   0x3   :  { %14 = vsyncpa [#allocation6], 0 }
   0x4   :  { %16 = vsyncpa [#allocation6 + $0x1], 0  ;;  %s1652_s18 = smov 0   ;;  %s1654_s19 = smov 0  }
   0x5   :  { %s1656_s20 = smov 0   ;;  %s1658_s21 = smov 0  }
   0x6 LB: > { %s1673_s22 = sadd.s32 4294967295, %s1608_s21   ;;  %s1122_s23 = sadd.s32 4294967294, %s1608_s21   ;;  %s1608_s21 = sphi %s1658_s21, %s2028_s21   ;;  %s1604_s20 = sphi %s1656_s20, %s2027_s20   ;;  %s1600_s19 = sphi %s1654_s19, %s2026_s19   ;;  %s1596_s18 = sphi %s1652_s18, %s2025_s18  }
   0x7   : > { %p42_p0 = scmp.ne.s32.totalorder %s1600_s19, %s1596_s18  ;;  %p2001_p1 = scmp.eq.s32.totalorder %s1673_s22, 0 }
   0x8   : > { %p156_p3 = scmp.eq.s32.totalorder %s1122_s23, 1  ;;  %p1123_p5 = scmp.ge.s32.totalorder %s1608_s21, 1 }
   0x9   : > { %p1682_p4 = por %p2001_p1, %p42_p0  ;;  %p163_p7 = scmp.lt.s32.totalorder %s1608_s21, 3 }
   0xa   : > { %p1687_p6 = por %p156_p3, %p42_p0  ;;  %s1610_s27 = smov [#allocation7]  }
   0xb   : > { %s2004_s24 = scalar_select %p1682_p4, 1, 0 }
   0xc   : > { %s2005_s25 = scalar_select %p1687_p6, 1, 0 }
   0xd   : > { %p1692_p8 = pnand %p1123_p5, %p163_p7  ;;  %s175_s28 = sshll.u32 %s1610_s27, 4  ;;  %s1696_s28 = int_to_ptr.vmem [resolvable:$true] %s175_s28 }
   0xe   : > { %s1611_s30 = smov [#allocation9]   ;;  %s1452_s9 = scalar_lea.hbm %s1996_s1, 1536 }
   0xf   : > { %p1347_p9 = pneg %p1692_p8  ;;  %s191_s6 = sshll.u32 %s1611_s30, 4  ;;  %s1707_s6 = int_to_ptr.vmem [resolvable:$true] %s191_s6 }
  0x10   : > { %p1453_p12 = scmp.ne.s32.totalorder %s1996_s1, %s1452_s9  ;;  %p1459_p5 = scmp.lt.u32.totalorder %s1452_s9, %s1996_s1 }
  0x11   : > { %p1703_p11 = pnand %p1347_p9, %p2001_p1 }
  0x13   : > { %p1454_p13 = pneg %p1703_p11 }
  0x15   : > { %p1455_p0 = pnand %p1454_p13, %p1453_p12 }
  0x17   : > { %p1456_p3 = pneg %p1455_p0 }
  0x19   : > { %p1461_p7 = pnand %p1459_p5, %p1456_p3 }
  0x1b   : > { %1464 = shalt.err (!%p1461_p7)
}
  0x1c   : > { %s1465_s14 = scalar_lea.vmem %s1696_s28, 1536  ;;  %p1473_p2 = scmp.lt.s32.totalorder %s1696_s28, %s1696_s28 }
  0x1d   : > { %p1466_p9 = scmp.ne.s32.totalorder %s1696_s28, %s1465_s14  ;;  %p1474_p12 = scmp.lt.s32.totalorder %s1465_s14, %s1465_s14 }
  0x1f   : > { %p1468_p10 = pnand %p1466_p9, %p1454_p13  ;;  %p1475_p0 = por %p1474_p12, %p1473_p2 }
  0x21   : > { %p1469_p1 = pneg %p1468_p10 }
  0x23   : > { %p1476_p6 = pnand %p1475_p0, %p1469_p1 }
  0x25   : > { %1479 = shalt.err (!%p1476_p6)
}
  0x26   : > { %s1612_s15 = smov 64   ;;  %s1613_s16 = smov 4  }
  0x27   : > { %1350 = dma.hbm_to_vmem [thread:$0]  (!%p1703_p11), %s1996_s1, 1536, %s1696_s28, [#allocation8], %s1612_s15, %s1612_s15, %s1613_s16  }
  0x28   : > { %s1480_s7 = scalar_lea.hbm %s1998_s3, 3072 }
  0x29   : > { %p1481_p2 = scmp.ne.s32.totalorder %s1998_s3, %s1480_s7  ;;  %p1487_p10 = scmp.lt.u32.totalorder %s1480_s7, %s1998_s3 }
  0x2b   : > { %p1483_p1 = pnand %p1481_p2, %p1454_p13 }
  0x2d   : > { %p1484_p6 = pneg %p1483_p1 }
  0x2f   : > { %p1489_p3 = pnand %p1487_p10, %p1484_p6 }
  0x31   : > { %1492 = shalt.err (!%p1489_p3)
}
  0x32   : > { %s1493_s28 = scalar_lea.vmem %s1707_s6, 3072  ;;  %p1501_p12 = scmp.lt.s32.totalorder %s1707_s6, %s1707_s6 }
  0x33   : > { %p1494_p5 = scmp.ne.s32.totalorder %s1707_s6, %s1493_s28  ;;  %p1502_p0 = scmp.lt.s32.totalorder %s1493_s28, %s1493_s28 }
  0x35   : > { %p1496_p7 = pnand %p1494_p5, %p1454_p13  ;;  %p1503_p2 = por %p1502_p0, %p1501_p12 }
  0x37   : > { %p1497_p9 = pneg %p1496_p7 }
  0x39   : > { %p1504_p1 = pnand %p1503_p2, %p1497_p9 }
  0x3b   : > { %1507 = shalt.err (!%p1504_p1)
}
  0x3c   : > { %1353 = dma.hbm_to_vmem [thread:$0]  (!%p1703_p11), %s1998_s3, 3072, %s1707_s6, [#allocation8], %s1612_s15, %s1612_s15, %s1613_s16  }
  0x3d   : > { %s1762_s14 = sadd.s32 1, %s1608_s21   ;;  %s29_s29 = sadd.s32 1, %s1604_s20 }
  0x3e   : > { %s26_s17 = ssub.s32 %s1608_s21, %s1762_s14  ;;  %p36_p13 = scmp.ne.s32.totalorder %s1604_s20, %s1600_s19 }
  0x3f   : > { %p27_p6 = scmp.eq.s32.totalorder %s26_s17, 0  ;;  %p37_p10 = scmp.eq.s32.totalorder %s1608_s21, 0 }
  0x40   : > { %p2008_p3 = scmp.eq.s32.totalorder %s1673_s22, 1  ;;  %p1364_p7 = scmp.lt.s32.totalorder %s1608_s21, 2 }
  0x41   : > { %s1778_s27 = scalar_select %p27_p6, %s1604_s20, %s29_s29  }
  0x42   : > { %p1772_p5 = por %p2008_p3, %p36_p13  ;;  %p38_p9 = por %p37_p10, %p36_p13 }
  0x43   : > { %s208_s30 = sand.u32 1, %s1604_s20   ;;  %s1191_s6 = sshll.u32 %s1608_s21, 8 }
  0x44   : > { %s2009_s23 = scalar_select %p1772_p5, 1, 0 }
  0x45   : > { %s1127_s7 = sshll.u32 %s208_s30, 4  ;;  %s1785_s8 = scalar_lea.hbm %s1995_s0, %s1191_s6 }
  0x46   : > { %s212_s9 = scalar_lea.vmem [#allocation4], %s1127_s7  ;;  %p1789_p11 = pnand %p1364_p7, %p38_p9 }
  0x47   : > { %s219_s10 = sshll.u32 %s212_s9, 4  ;;  %s1793_s28 = scalar_lea.sflag [#allocation5], %s208_s30  ;;  %s1787_s10 = int_to_ptr.vmem [resolvable:$true] %s219_s10 }
  0x48   : > { %s1508_s12 = scalar_lea.hbm %s1785_s8, 256  ;;  %p1510_p0 = pneg %p1789_p11 }
  0x49   : > { %p1509_p12 = scmp.ne.s32.totalorder %s1785_s8, %s1508_s12  ;;  %s1513_s17 = scalar_lea.hbm %s1995_s0, 512 }
  0x4a   : > { %p1514_p13 = scmp.lt.u32.totalorder %s1785_s8, %s1995_s0  ;;  %p1515_p6 = scmp.lt.u32.totalorder %s1513_s17, %s1508_s12 }
  0x4b   : > { %p1511_p2 = pnand %p1510_p0, %p1509_p12  ;;  %p1517_p3 = scmp.lt.u32.totalorder %s1508_s12, %s1785_s8 }
  0x4c   : > { %p1516_p10 = por %p1515_p6, %p1514_p13 }
  0x4d   : > { %p1512_p1 = pneg %p1511_p2 }
  0x4e   : > { %p1518_p7 = por %p1517_p3, %p1516_p10 }
  0x50   : > { %p1519_p9 = pnand %p1518_p7, %p1512_p1 }
  0x52   : > { %1522 = shalt.err (!%p1519_p9)
}
  0x53   : > { %s1523_s30 = scalar_lea.vmem %s1787_s10, 256  ;;  %s1614_s15 = smov [#allocation4]  }
  0x54   : > { %p1524_p12 = scmp.ne.s32.totalorder %s1787_s10, %s1523_s30  ;;  %s1528_s16 = sshll.u32 %s1614_s15, 4  ;;  %s1529_s16 = int_to_ptr.vmem [resolvable:$false] %s1528_s16 }
  0x55   : > { %s1530_s9 = scalar_lea.vmem %s1529_s16, 512  ;;  %p1531_p4 = scmp.lt.s32.totalorder %s1787_s10, %s1529_s16 }
  0x56   : > { %p1526_p2 = pnand %p1524_p12, %p1510_p0  ;;  %p1532_p13 = scmp.lt.s32.totalorder %s1530_s9, %s1523_s30 }
  0x58   : > { %p1527_p5 = pneg %p1526_p2  ;;  %p1533_p6 = por %p1532_p13, %p1531_p4 }
  0x5a   : > { %p1534_p10 = pnand %p1533_p6, %p1527_p5 }
  0x5c   : > { %1537 = shalt.err (!%p1534_p10)
}
  0x5d   : > { %s1615_s12 = smov 128   ;;  %s1616_s13 = smov 8  }
  0x5e   : > { %1357 = dma.hbm_to_vmem [thread:$0]  (!%p1789_p11), %s1785_s8, 256, %s1787_s10, %s1793_s28, %s1615_s12, %s1615_s12, %s1616_s13  }
  0x5f   : > { %231 = sbr.rel (%p1692_p8) target bundleno = 670 (0x29e), region = 40  ;;  %s1824_s29 = sand.u32 (!%p1692_p8), 1, %s1600_s19  }
  0x60   : > { %s1131_s17 = sshll.u32 (!%p1692_p8), %s1824_s29, 4  ;;  %s234_s7 = scalar_lea.sflag (!%p1692_p8), [#allocation5], %s1824_s29 }
  0x61   : > { %s1830_s6 = scalar_lea.vmem (!%p1692_p8), [#allocation4], %s1131_s17  ;;  %p2011_p4 = scmp.ne.s32.totalorder (!%p1692_p8), %s2004_s24, 0 }
  0x66   : > { %1583 = dma.done.wait (%p2011_p4), %s234_s7, 256  }
  0x67   : > { %1585 = vsyncadd (%p2011_p4), %s234_s7, 4294967040  ;;  %p2012_p5 = scmp.eq.s32.totalorder %s1673_s22, 0 }
  0x69   : > { %1587 = dma.done.wait (%p2012_p5), [#allocation8], 4608   ;;  %p2013_p8 = pmov %p2012_p5 }
  0x6a   : > { %v1617_v0 = vmov 0.0   ;;  %vm1618_vm0 = vmmov 0   ;;  %vm274_vm1 = vsmask.f32 256  ;;  %vm279_vm2 = vsmask.f32 7938 }
  0x6b   : > { %1589 = vsyncadd (%p2013_p8), [#allocation8], 4294962688  ;;  %1239 = vmatprep.subr.bf16.mxu0 %v1617_v0  ;;  %1251 = vmatprep.subr.bf16.mxu1 %v1617_v0  ;;  %v1410_v1 = vld [vmem:[#allocation7 + $0x20] sm:$0xff]   ;;  %vm273_vm3 = vcmask 516096   ;;  %v1412_v3 = vld [vmem:[#allocation7 + $0x28] sm:$0xff]   ;;  %vm314_vm7 = vcmask 519168  }
  0x6c   : > { %1247 = vmatprep.mubr.msk.bf16.mxu0 %vm1618_vm0, %v1617_v0  ;;  %1259 = vmatprep.mubr.msk.bf16.mxu1 %vm1618_vm0, %v1617_v0  ;;  %v1411_v2 = vld [vmem:[#allocation7] sm:$0xff]   ;;  %v1413_v4 = vld [vmem:[#allocation7 + $0x8] sm:$0xff]   ;;  %vm1849_vm4 = vmand %vm273_vm3, %vm274_vm1  ;;  %vm292_vm6 = vsmask.f32 4368  ;;  %vm389_vm10 = vcmask 523264   ;;  %vm514_vm12 = vcmask 1046528  }
  0x6d   : > { %1240 = vmatpush3.bf16.msra.mxu0 %v1410_v1  ;;  %1252 = vmatpush3.bf16.msra.mxu1 %v1411_v2  ;;  %vm1854_vm5 = vmand %vm273_vm3, %vm279_vm2  ;;  %v1414_v7 = vld [vmem:[#allocation7 + $0x30] sm:$0xff]   ;;  %v276_v9 = vld [vmem:[#allocation2] sm:$0x1]  ;;  %vm352_vm11 = vsmask.f32 7424  ;;  %vm603_vm13 = vcmask 1040384  }
  0x6e   : > { %1241 = vmatprep.subr.bf16.mxu0 %v1617_v0  ;;  %1253 = vmatprep.subr.bf16.mxu1 %v1617_v0  ;;  %v1415_v8 = vld [vmem:[#allocation7 + $0x10] sm:$0xff]   ;;  %v1416_v12 = vld [vmem:[#allocation7 + $0x38] sm:$0xff]   ;;  %v277_v13 = vsel %vm1849_vm4, 0, %v276_v9  ;;  %vm1870_vm8 = vmor %vm274_vm1, %vm292_vm6  ;;  %s271_s11 = scalar_lea.vmem [#allocation10], %s1131_s17  ;;  %s1196_s30 = sshll.u32 %s1673_s22, 8 }
  0x6f   : > { %v281_v10 = vld [vmem:[#allocation2 + $0x8] sm:$0x1]  ;;  %v285_v15 = vld [vmem:[%s1830_s6 + $0x8] sm:$0xff]  ;;  %278 = vst [vmem:[#allocation2] sm:$0x1] %v277_v13  ;;  %vm315_vm9 = vmand %vm314_vm7, %vm279_vm2  ;;  %s1030_s28 = sshll.u32 %s271_s11, 4  ;;  %s1951_s9 = scalar_lea.hbm %s2000_s5, %s1196_s30  ;;  %s1946_s28 = int_to_ptr.vmem [resolvable:$true] %s1030_s28 }
  0x70   : > { %v284_v11 = vld [vmem:[%s1830_s6] sm:$0xff]  ;;  %v282_v14 = vsel %vm1854_vm5, 0, %v281_v10  ;;  %v1193_v17 = vpack.c.bf16 %v285_v15, %v285_v15  ;;  %v1417_v18 = vld [vmem:[#allocation7 + $0x18] sm:$0xff]   ;;  %v1421_v47 = vld [vmem:[#allocation7 + $0x48] sm:$0xff]   ;;  %s1017_s22 = scalar_lea.sflag [#allocation6], %s1824_s29  ;;  %s1538_s12 = scalar_lea.vmem %s1946_s28, 256 }
  0x71   : > { %1242 = vmatpush3.bf16.msra.mxu0 %v1412_v3  ;;  %1254 = vmatpush3.bf16.msra.mxu1 %v1413_v4  ;;  %v1192_v16 = vpack.c.bf16 %v284_v11, %v284_v11  ;;  %283 = vst [vmem:[#allocation2 + $0x8] sm:$0x1] %v282_v14  ;;  %v1420_v44 = vld [vmem:[#allocation7 + $0x40] sm:$0xff]   ;;  %v1422_v49 = vld [vmem:[#allocation7 + $0x50] sm:$0xff]   ;;  %v1423_v51 = vld [vmem:[#allocation7 + $0x58] sm:$0xff]   ;;  %p1539_p11 = scmp.ne.s32.totalorder %s1946_s28, %s1538_s12  ;;  %p2022_p0 = scmp.ne.s32.totalorder %s2009_s23, 0 }
  0x72   : > { %1243 = vmatprep.subr.bf16.mxu0 %v1617_v0  ;;  %1255 = vmatprep.subr.bf16.mxu1 %v1617_v0  ;;  %v303_v21 = vshrl.u32 %v1193_v17, 16  ;;  %v306_v22 = vshll.u32 %v1193_v17, 16  ;;  %v1425_v55 = vld [vmem:[#allocation9] sm:$0xff]   ;;  %v1426_v56 = vld [vmem:[#allocation9 + $0x8] sm:$0xff]   ;;  %v1428_v58 = vld [vmem:[#allocation9 + $0x10] sm:$0xff]   ;;  %s1619_s13 = smov [#allocation10]  }
  0x73   : > { %v295_v19 = vshrl.u32 %v1192_v16, 16  ;;  %v298_v20 = vshll.u32 %v1192_v16, 16  ;;  %v1427_v57 = vld [vmem:[#allocation9 + $0x40] sm:$0xff]   ;;  %vm1902_vm14 = vmand %vm603_vm13, %vm274_vm1  ;;  %v605_v60 = vld [vmem:[#allocation3] sm:$0x1]  ;;  %p1540_p1 = pnand %p1539_p11, %p2022_p0  ;;  %s1542_s17 = sshll.u32 %s1619_s13, 4  ;;  %s1543_s17 = int_to_ptr.vmem [resolvable:$false] %s1542_s17 }
  0x74   : > { %v305_v25 = vrot.slane %v303_v21, 7  ;;  %v1429_v61 = vld [vmem:[#allocation9 + $0x48] sm:$0xff]   ;;  %v606_v62 = vsel %vm1902_vm14, 0, %v605_v60  ;;  %vm608_vm15 = vmand %vm603_vm13, %vm279_vm2  ;;  %v609_v63 = vld [vmem:[#allocation3 + $0x8] sm:$0x1]  ;;  %s1544_s7 = scalar_lea.vmem %s1543_s17, 512  ;;  %p1545_p7 = scmp.lt.s32.totalorder %s1946_s28, %s1543_s17 }
  0x75   : > { %1244 = vmatpush3.bf16.msra.mxu0 %v1414_v7  ;;  %1256 = vmatpush3.bf16.msra.mxu1 %v1415_v8  ;;  %v297_v23 = vrot.slane %v295_v19, 7  ;;  %607 = vst [vmem:[#allocation3] sm:$0x1] %v606_v62  ;;  %v1430_v1 = vld [vmem:[#allocation9 + $0x18] sm:$0xff]   ;;  %v610_v2 = vsel %vm608_vm15, 0, %v609_v63  ;;  %v1431_v3 = vld [vmem:[#allocation9 + $0x50] sm:$0xff]   ;;  %p1541_p3 = pneg %p1540_p1  ;;  %p1546_p9 = scmp.lt.s32.totalorder %s1544_s7, %s1538_s12 }
  0x76   : > { %1245 = vmatprep.subr.bf16.mxu0 %v1617_v0  ;;  %1257 = vmatprep.subr.bf16.mxu1 %v1617_v0  ;;  %v308_v28 = vor.u32 %v306_v22, %v305_v25  ;;  %v310_v29 = vrot.slane %v305_v25, 4  ;;  %v316_v30 = vld [vmem:[#allocation2] sm:$0xf]  ;;  %611 = vst [vmem:[#allocation3 + $0x8] sm:$0x1] %v610_v2  ;;  %v1432_v4 = vld [vmem:[#allocation9 + $0x20] sm:$0xff]  }
  0x77   : > { %v300_v26 = vor.u32 %v298_v20, %v297_v23  ;;  %v301_v27 = vrot.slane %v297_v23, 4  ;;  %v1433_v5 = vld [vmem:[#allocation9 + $0x58] sm:$0xff]   ;;  %v1434_v6 = vld [vmem:[#allocation9 + $0x28] sm:$0xff]   ;;  %v1435_v7 = vld [vmem:[#allocation9 + $0x60] sm:$0xff]   ;;  %p1547_p12 = por %p1546_p9, %p1545_p7 }
  0x78   : > { %v321_v31 = vld [vmem:[#allocation2 + $0x8] sm:$0x1]  ;;  %v1437_v9 = vld [vmem:[#allocation9 + $0x68] sm:$0xff]   ;;  %v1438_v10 = vld [vmem:[#allocation9 + $0x38] sm:$0xff]  }
  0x79   : > { %1246 = vmatpush3.bf16.msra.mxu0 %v1416_v12  ;;  %1258 = vmatpush3.bf16.msra.mxu1 %v1417_v18  ;;  %v309_v32 = vsel %vm1870_vm8, %v301_v27, %v308_v28  ;;  %v317_v33 = vsel %vm315_vm9, %v300_v26, %v316_v30  ;;  %v322_v34 = vsel %vm1849_vm4, %v310_v29, %v321_v31  ;;  %v1436_v8 = vld [vmem:[#allocation9 + $0x30] sm:$0xff]   ;;  %v1441_v12 = vld [vmem:[#allocation9 + $0x78] sm:$0xff]   ;;  %v1155_v25 = vld [vmem:[%s1997_s2] ss:$0 sm:$0xff]  ;;  %vm638_vm4 = vcmask 1043456   ;;  %p1548_p2 = pnand %p1547_p12, %p1541_p3 }
  0x7a   : > { %1263 = vmatprep.subr.bf16.mxu0 %v1617_v0  ;;  %1275 = vmatprep.subr.bf16.mxu1 %v1617_v0  ;;  %318 = vst [vmem:[#allocation2] sm:$0xf] %v317_v33  ;;  %320 = vst.msk [vmem:[#allocation2 + $0x4] sm:$0xf] %vm314_vm7, %v309_v32  ;;  %v1439_v11 = vld [vmem:[#allocation9 + $0x70] sm:$0xff]   ;;  %v1443_v2 = vld [vmem:[#allocation9 + $0x80] sm:$0xff]  }
  0x7b   : > { %323 = vst [vmem:[#allocation2 + $0x8] sm:$0x1] %v322_v34  ;;  %vm639_vm5 = vmand %vm638_vm4, %vm279_vm2  ;;  %v1444_v59 = vld [vmem:[#allocation9 + $0x88] sm:$0xff]  }
  0x81   : > { %v324_v35 = vld [vmem:[#allocation2] sm:$0xf]  ;;  %v325_v36 = vld [vmem:[#allocation2 + $0x4] sm:$0xf] }
  0x82   : > { %v1137_v37 = vcombine.low %v324_v35, %v325_v36  ;;  %v1419_v38 = vld [vmem:[#allocation2 + $0x8] ss:$0 sps:$4 sm:$0x11]   ;;  %v501_v48 = vld [vmem:[#allocation2] sm:$0xe] }
  0x83   : > { %v361_v41 = vshll.u32 %v1419_v38, 16  ;;  %v1149_v50 = vcombine.low %v501_v48, %v325_v36  ;;  %v516_v53 = vrot.slane %v1419_v38, 1 }
  0x84   : > { %v354_v39 = vshrl.u32 %v1137_v37, 16  ;;  %v356_v40 = vshll.u32 %v1137_v37, 16  ;;  %1260 = vmatmul.mubr.msk.bf16.vlgmr.msra.gmra.mrb[0].mxu1 %vm389_vm10, %v1137_v37 }
  0x85   : > { %1291 = vmatprep.mubr.msk.bf16.mxu1 %vm1618_vm0, %v1617_v0  ;;  %v363_v43 = vrot.slane %v361_v41, 1  ;;  %v515_v52 = vrot.slane %v1149_v50, 1  ;;  %1276 = vmatpush3.bf16.msra.mxu1 %v1427_v57 }
  0x86   : > { %v358_v42 = vrot.slane %v356_v40, 1  ;;  %1277 = vmatprep.subr.bf16.mxu1 %v1617_v0 }
  0x87   : > { %v517_v54 = vsel %vm514_vm12, %v515_v52, %v516_v53 }
  0x88   : > { %v359_v45 = vor.u32 %v358_v42, %v354_v39 }
  0x89   : > { %1278 = vmatpush3.bf16.msra.mxu1 %v1429_v61 }
  0x8a   : > { %v364_v46 = vsel %vm352_vm11, %v359_v45, %v363_v43  ;;  %1279 = vmatprep.subr.bf16.mxu1 %v1617_v0  ;;  %v640_v43 = vld [vmem:[#allocation3] sm:$0xf] }
  0x8b   : > { %1248 = vmatmul.mubr.msk.bf16.vlgmr.msra.gmra.mrb[0].mxu0 %vm389_vm10, %v364_v46 }
  0x8c   : > { %1264 = vmatpush3.bf16.msra.mxu0 %v1420_v44  ;;  %1271 = vmatprep.mubr.msk.bf16.mxu0 %vm1618_vm0, %v1617_v0 }
  0x8d   : > { %1265 = vmatprep.subr.bf16.mxu0 %v1617_v0  ;;  %1280 = vmatpush3.bf16.msra.mxu1 %v1431_v3  ;;  %v1445_v3 = vld [vmem:[#allocation9 + $0x90] sm:$0xff]  }
  0x8e   : > { %1281 = vmatprep.subr.bf16.mxu1 %v1617_v0 }
  0x90   : > { %1266 = vmatpush3.bf16.msra.mxu0 %v1421_v47  ;;  %v644_v47 = vld [vmem:[#allocation3 + $0x8] sm:$0x1] }
  0x91   : > { %1267 = vmatprep.subr.bf16.mxu0 %v1617_v0  ;;  %1282 = vmatpush3.bf16.msra.mxu1 %v1433_v5  ;;  %v1447_v5 = vld [vmem:[#allocation9 + $0xa0] sm:$0xff]  }
  0x92   : > { %1283 = vmatprep.subr.bf16.mxu1 %v1617_v0 }
  0x94   : > { %1268 = vmatpush3.bf16.msra.mxu0 %v1422_v49 }
  0x95   : > { %1269 = vmatprep.subr.bf16.mxu0 %v1617_v0  ;;  %1284 = vmatpush3.bf16.msra.mxu1 %v1435_v7  ;;  %v1449_v7 = vld [vmem:[#allocation9 + $0xb0] sm:$0xff]  }
  0x96   : > { %1285 = vmatprep.subr.bf16.mxu1 %v1617_v0 }
  0x98   : > { %1270 = vmatpush3.bf16.msra.mxu0 %v1423_v51 }
  0x99   : > { %1295 = vmatprep.subr.bf16.mxu0 %v1617_v0  ;;  %1286 = vmatpush3.bf16.msra.mxu1 %v1437_v9 }
  0x9a   : > { %1287 = vmatprep.subr.bf16.mxu1 %v1617_v0 }
  0x9b   : > { %1272 = vmatmul.mubr.msk.bf16.vlgmr.msra.gmra.mrb[4].mxu0 %vm389_vm10, %v517_v54 }
  0x9c   : > { %1311 = vmatprep.mubr.msk.bf16.mxu0 %vm1618_vm0, %v1617_v0  ;;  %1296 = vmatpush3.bf16.msra.mxu0 %v1425_v55 }
  0x9d   : > { %1297 = vmatprep.subr.bf16.mxu0 %v1617_v0  ;;  %1288 = vmatpush3.bf16.msra.mxu1 %v1439_v11 }
  0x9e   : > { %1289 = vmatprep.subr.bf16.mxu1 %v1617_v0 }
  0xa0   : > { %1298 = vmatpush3.bf16.msra.mxu0 %v1426_v56 }
  0xa1   : > { %1299 = vmatprep.subr.bf16.mxu0 %v1617_v0  ;;  %1290 = vmatpush3.bf16.msra.mxu1 %v1441_v12 }
  0xa2   : > { %1315 = vmatprep.subr.bf16.mxu1 %v1617_v0 }
  0xa4   : > { %1300 = vmatpush3.bf16.msra.mxu0 %v1428_v58 }
  0xa5   : > { %1301 = vmatprep.subr.bf16.mxu0 %v1617_v0 }
  0xa8   : > { %1302 = vmatpush3.bf16.msra.mxu0 %v1430_v1 }
  0xa9   : > { %1303 = vmatprep.subr.bf16.mxu0 %v1617_v0 }
  0xac   : > { %1304 = vmatpush3.bf16.msra.mxu0 %v1432_v4  ;;  %v1446_v4 = vld [vmem:[#allocation9 + $0x98] sm:$0xff]  }
  0xad   : > { %1305 = vmatprep.subr.bf16.mxu0 %v1617_v0 }
  0xb0   : > { %1306 = vmatpush3.bf16.msra.mxu0 %v1434_v6  ;;  %v1448_v6 = vld [vmem:[#allocation9 + $0xa8] sm:$0xff]  }
  0xb1   : > { %1307 = vmatprep.subr.bf16.mxu0 %v1617_v0 }
  0xb4   : > { %1308 = vmatpush3.bf16.msra.mxu0 %v1436_v8 }
  0xb5   : > { %1309 = vmatprep.subr.bf16.mxu0 %v1617_v0 }
  0xb8   : > { %1310 = vmatpush3.bf16.msra.mxu0 %v1438_v10  ;;  %v1450_v10 = vld [vmem:[#allocation9 + $0xb8] sm:$0xff]  }
 0x157   : > { %v494_v13 = vpop.f32.mrb[0].mxu1 }
 0x158   : > { %v1261_v14 = vpop.f32.mrb[1].mxu1 }
 0x159   : > { %v497_v15 = vpop.f32.mrb[2].mxu1 }
 0x15a   : > { %v1262_v16 = vpop.f32.mrb[3].mxu1 }
 0x15e   : > { %v427_v17 = vpop.f32.mrb[0].mxu0 }
 0x15f   : > { %v495_v18 = vadd.f32 %v494_v13, %v427_v17  ;;  %v1249_v19 = vpop.f32.mrb[1].mxu0 }
 0x160   : > { %v430_v20 = vpop.f32.mrb[2].mxu0 }
 0x161   : > { %v498_v21 = vadd.f32 %v497_v15, %v430_v20  ;;  %v1250_v22 = vpop.f32.mrb[3].mxu0 }
 0x16e   : > { %v579_v23 = vpop.f32.mrb[4].mxu0 }
 0x16f   : > { %v586_v26 = vadd.f32 %v579_v23, %v495_v18  ;;  %v1273_v27 = vpop.f32.mrb[5].mxu0 }
 0x170   : > { %v582_v28 = vpop.f32.mrb[6].mxu0 }
 0x171   : > { %v595_v29 = vadd.f32 %v1155_v25, %v586_v26  ;;  %v587_v30 = vadd.f32 %v582_v28, %v498_v21  ;;  %v1274_v31 = vpop.f32.mrb[7].mxu0 }
 0x173   : > { %vm597_vm1 = vcmp.gt.f32.partialorder %v595_v29, 0.0  ;;  %v599_v32 = vmul.f32 -0.2, %v595_v29  ;;  %v596_v33 = vadd.f32 %v1155_v25, %v587_v30 }
 0x175   : > { %v601_v34 = vsel %vm597_vm1, %v595_v29, %v599_v32  ;;  %vm598_vm3 = vcmp.gt.f32.partialorder %v596_v33, 0.0  ;;  %v600_v35 = vmul.f32 -0.2, %v596_v33 }
 0x176   : > { %v1194_v36 = vpack.c.bf16 %v601_v34, %v601_v34 }
 0x177   : > { %v602_v37 = vsel %vm598_vm3, %v596_v33, %v600_v35 }
 0x178   : > { %v619_v38 = vshrl.u32 %v1194_v36, 16  ;;  %v1195_v39 = vpack.c.bf16 %v602_v37, %v602_v37  ;;  %v622_v41 = vshll.u32 %v1194_v36, 16 }
 0x17a   : > { %v621_v40 = vrot.slane %v619_v38, 7  ;;  %v627_v42 = vshrl.u32 %v1195_v39, 16  ;;  %v630_v46 = vshll.u32 %v1195_v39, 16 }
 0x17c   : > { %v624_v44 = vor.u32 %v622_v41, %v621_v40  ;;  %v629_v45 = vrot.slane %v627_v42, 7  ;;  %v625_v48 = vrot.slane %v621_v40, 4 }
 0x17e   : > { %v641_v49 = vsel %vm639_vm5, %v624_v44, %v640_v43  ;;  %v632_v50 = vor.u32 %v630_v46, %v629_v45  ;;  %v634_v51 = vrot.slane %v629_v45, 4 }
 0x17f   : > { %642 = vst [vmem:[#allocation3] sm:$0xf] %v641_v49 }
 0x180   : > { %v633_v52 = vsel %vm1870_vm8, %v625_v48, %v632_v50  ;;  %v645_v53 = vsel %vm1902_vm14, %v634_v51, %v644_v47 }
 0x181   : > { %643 = vst [vmem:[#allocation3 + $0x4] sm:$0xf] %v633_v52  ;;  %646 = vst [vmem:[#allocation3 + $0x8] sm:$0x1] %v645_v53 }
 0x186   : > { %v647_v54 = vld [vmem:[#allocation3] sm:$0xf] }
 0x187   : > { %v883_v8 = vld [vmem:[#allocation3] sm:$0xe] }
 0x188   : > { %v648_v55 = vld [vmem:[#allocation3 + $0x4] sm:$0xf]  ;;  %v1442_v57 = vld [vmem:[#allocation3 + $0x8] ss:$0 sps:$4 sm:$0x11]  }
 0x189   : > { %v1158_v56 = vcombine.low %v647_v54, %v648_v55  ;;  %v699_v60 = vshll.u32 %v1442_v57, 16  ;;  %v1176_v9 = vcombine.low %v883_v8, %v648_v55  ;;  %v905_v12 = vrot.slane %v1442_v57, 1 }
 0x18b   : > { %1312 = vmatmul.mubr.bf16.vlgmr.msra.gmra.mrb[8].mxu0 %v1158_v56  ;;  %v694_v58 = vshll.u32 %v1158_v56, 16  ;;  %v692_v61 = vshrl.u32 %v1158_v56, 16  ;;  %v701_v1 = vrot.slane %v699_v60, 1  ;;  %v904_v11 = vrot.slane %v1176_v9, 1 }
 0x18d   : > { %v696_v62 = vrot.slane %v694_v58, 1  ;;  %v906_v13 = vsel %vm514_vm12, %v904_v11, %v905_v12 }
 0x18f   : > { %v697_v63 = vor.u32 %v696_v62, %v692_v61 }
 0x191   : > { %v702_v24 = vsel %vm352_vm11, %v697_v63, %v701_v1 }
 0x192   : > { %1292 = vmatmul.mubr.bf16.vlgmr.msra.gmra.mrb[4].mxu1 %v702_v24 }
 0x193   : > { %1316 = vmatpush3.bf16.msra.mxu1 %v1443_v2  ;;  %1331 = vmatprep.mubr.msk.bf16.mxu1 %vm1618_vm0, %v1617_v0 }
 0x194   : > { %1317 = vmatprep.subr.bf16.mxu1 %v1617_v0 }
 0x197   : > { %1318 = vmatpush3.bf16.msra.mxu1 %v1444_v59 }
 0x198   : > { %1319 = vmatprep.subr.bf16.mxu1 %v1617_v0 }
 0x19b   : > { %1320 = vmatpush3.bf16.msra.mxu1 %v1445_v3 }
 0x19c   : > { %1321 = vmatprep.subr.bf16.mxu1 %v1617_v0 }
 0x19f   : > { %1322 = vmatpush3.bf16.msra.mxu1 %v1446_v4 }
 0x1a0   : > { %1323 = vmatprep.subr.bf16.mxu1 %v1617_v0 }
 0x1a3   : > { %1324 = vmatpush3.bf16.msra.mxu1 %v1447_v5 }
 0x1a4   : > { %1325 = vmatprep.subr.bf16.mxu1 %v1617_v0 }
 0x1a7   : > { %1326 = vmatpush3.bf16.msra.mxu1 %v1448_v6 }
 0x1a8   : > { %1327 = vmatprep.subr.bf16.mxu1 %v1617_v0 }
 0x1ab   : > { %1328 = vmatpush3.bf16.msra.mxu1 %v1449_v7 }
 0x1ac   : > { %1329 = vmatprep.subr.bf16.mxu1 %v1617_v0  ;;  %v1185_v0 = vld [vmem:[%s1999_s4] ss:$0 sm:$0xff] }
 0x1af   : > { %1330 = vmatpush3.bf16.msra.mxu1 %v1450_v10 }
 0x1b2   : > { %1332 = vmatmul.mubr.bf16.vlgmr.msra.gmra.mrb[8].mxu1 %v906_v13 }
 0x25e   : > { %v876_v14 = vpop.f32.mrb[8].mxu0 }
 0x25f   : > { %v1313_v15 = vpop.f32.mrb[9].mxu0 }
 0x260   : > { %v879_v16 = vpop.f32.mrb[10].mxu0 }
 0x261   : > { %v1314_v17 = vpop.f32.mrb[11].mxu0 }
 0x265   : > { %v786_v18 = vpop.f32.mrb[4].mxu1 }
 0x266   : > { %v877_v19 = vadd.f32 %v876_v14, %v786_v18  ;;  %v1293_v20 = vpop.f32.mrb[5].mxu1 }
 0x267   : > { %v789_v21 = vpop.f32.mrb[6].mxu1 }
 0x268   : > { %v880_v22 = vadd.f32 %v879_v16, %v789_v21  ;;  %v1294_v23 = vpop.f32.mrb[7].mxu1 }
 0x285   : > { %v990_v25 = vpop.f32.mrb[8].mxu1 }
 0x286   : > { %v997_v26 = vadd.f32 %v990_v25, %v877_v19  ;;  %v1333_v27 = vpop.f32.mrb[9].mxu1 }
 0x287   : > { %v993_v28 = vpop.f32.mrb[10].mxu1 }
 0x288   : > { %v1006_v29 = vadd.f32 %v1185_v0, %v997_v26  ;;  %v998_v30 = vadd.f32 %v993_v28, %v880_v22  ;;  %v1334_v31 = vpop.f32.mrb[11].mxu1 }
 0x28a   : > { %vm1008_vm0 = vcmp.gt.f32.partialorder %v1006_v29, 0.0  ;;  %v1010_v32 = vmul.f32 -0.2, %v1006_v29  ;;  %v1007_v33 = vadd.f32 %v1185_v0, %v998_v30 }
 0x28c   : > { %v1012_v34 = vsel %vm1008_vm0, %v1006_v29, %v1010_v32  ;;  %vm1009_vm2 = vcmp.gt.f32.partialorder %v1007_v33, 0.0  ;;  %v1011_v35 = vmul.f32 -0.2, %v1007_v33 }
 0x28d   : > { %1014 = vst [vmem:[%s271_s11] sm:$0xff] %v1012_v34 }
 0x28e   : > { %v1013_v36 = vsel %vm1009_vm2, %v1007_v33, %v1011_v35 }
 0x28f   : > { %1015 = vst [vmem:[%s271_s11 + $0x8] sm:$0xff] %v1013_v36 }
 0x290   : > { %1551 = shalt.err (!%p1548_p2)
}
 0x291   : > { %s1552_s6 = scalar_lea.hbm %s1951_s9, 256  ;;  %s1556_s8 = scalar_lea.hbm %s2000_s5, 512 }
 0x292   : > { %p1553_p13 = scmp.ne.s32.totalorder %s1951_s9, %s1552_s6  ;;  %p1557_p4 = scmp.lt.u32.totalorder %s1951_s9, %s2000_s5 }
 0x293   : > { %p1558_p5 = scmp.lt.u32.totalorder %s1556_s8, %s1552_s6  ;;  %p1560_p11 = scmp.lt.u32.totalorder %s1552_s6, %s1951_s9 }
 0x294   : > { %p1554_p6 = pnand %p1553_p13, %p2022_p0 }
 0x295   : > { %p1559_p8 = por %p1558_p5, %p1557_p4 }
 0x296   : > { %p1555_p10 = pneg %p1554_p6 }
 0x297   : > { %p1561_p1 = por %p1560_p11, %p1559_p8 }
 0x299   : > { %p1562_p3 = pnand %p1561_p1, %p1555_p10 }
 0x29b   : > { %1565 = shalt.err (!%p1562_p3)
}
 0x29c   : > { %s1620_s30 = smov 128   ;;  %s1621_s15 = smov 8  }
 0x29d   : > { %1345 = dma.vmem_to_hbm [thread:$0]  (%p2022_p0), %s1946_s28, 256, %s1951_s9, %s1017_s22, %s1620_s30, %s1620_s30, %s1621_s15  }
 0x29e PF: > { %s1045_s16 = sand.u32 1, %s1596_s18   ;;  %p2023_p7 = scmp.ne.s32.totalorder %s2005_s25, 0 }
 0x29f   : > { %p2024_p9 = scmp.ge.s32.totalorder %s1608_s21, 2  ;;  %s1046_s12 = scalar_lea.sflag [#allocation6], %s1045_s16 }
 0x2a1   : > { %p1359_p12 = pnand %p2024_p9, %p2023_p7 }
 0x2a3   : > { %1591 = dma.done.wait (!%p1359_p12), %s1046_s12, 256  }
 0x2a4   : > { %1593 = vsyncadd (!%p1359_p12), %s1046_s12, 4294967040  ;;  %p19_p2 = scmp.ge.s32.totalorder %s1762_s14, 4   ;;  %s2025_s18 = smov %s1600_s19 }
 0x2a5   : > { %s2026_s19 = smov %s1604_s20  ;;  %s2027_s20 = smov %s1778_s27 }
 0x2a6   : > { %s2028_s21 = smov %s1762_s14  ;;  %21 = sbr.rel (!%p19_p2) target bundleno = 6 (0x6), region = 97 }
 0x2ad   :  { %1051 = vsyncpa [#allocation5], 1 }
 0x2ae   :  { %1053 = vsyncpa [#allocation5 + $0x1], 1 }
 0x2af   :  { %1054 = vsyncpa [#allocation8], 1 }
 0x2b0   :  { %1055 = vsyncpa [#allocation6], 1 }
 0x2b1   :  { %1057 = vsyncpa [#allocation6 + $0x1], 1 }

</bundles_post_ra>
